<compile_context>
chip_gen: v7x
topology: tpu7x:2x2x1
jax: 0.10.0
libtpu: 0.0.40
codegen_flags: <defaults>
</compile_context>

<pallas_src>
import functools

import jax
import jax.numpy as jnp
from jax.experimental import pallas as pl
from jax.experimental.pallas import tpu as pltpu

BN_EPS = 1e-5


def _round_up(v, m):
    return (v + m - 1) // m * m


def _tpu_vmem_capacity_bytes():
    """Physical per-core VMEM; conservative 64 MiB fallback (v7x-sized)."""
    cap = 64 * 1024 * 1024
    try:
        info = pltpu.get_tpu_info()
        cap = int(getattr(info, "vmem_capacity_bytes", cap))
    except Exception:
        pass
    return cap


# ---------------------------------------------------------------------------
# Two-pass path, pass 1: h = x @ W1 (bf16 MXU operands, f32 accumulate),
# store h as bf16, emit per-tile partial sum / sum-of-squares from the f32
# accumulator.  No bias, no row masking (see header comment).
# ---------------------------------------------------------------------------
def _linear1_stats_kernel(x_ref, w1_ref, h_ref, sum_ref, sq_ref):
    h = jnp.dot(x_ref[...], w1_ref[...], preferred_element_type=jnp.float32)
    h_ref[...] = h.astype(jnp.bfloat16)            # halve HBM writeback of h
    # BN statistics from the f32 accumulator (before the bf16 cast).
    sum_ref[...] = jnp.sum(h, axis=0, keepdims=True)[None]       # (1, 1, H)
    sq_ref[...] = jnp.sum(h * h, axis=0, keepdims=True)[None]    # (1, 1, H)


# ---------------------------------------------------------------------------
# Two-pass path, pass 2: in-kernel stats combine -> folded BN FMA -> ReLU ->
# out = hn @ W2 + b2.
# ---------------------------------------------------------------------------
def _bn_relu_linear2_kernel(psum_ref, psq_ref, gamma_ref, beta_ref, h_ref,
                            w2_ref, b2_ref, o_ref, *, inv_n):
    mean = jnp.sum(psum_ref[...], axis=0) * inv_n                 # (1, H)
    ex2 = jnp.sum(psq_ref[...], axis=0) * inv_n                   # (1, H)
    var = jnp.maximum(ex2 - mean * mean, 0.0)                     # clamp f32 cancellation
    scale = jax.lax.rsqrt(var + BN_EPS) * gamma_ref[...]          # (1, H)
    shift = beta_ref[...] - mean * scale                          # (1, H)
    h = h_ref[...].astype(jnp.float32) * scale + shift            # one FMA/elem
    h = jnp.maximum(h, 0.0)
    out = jnp.dot(h.astype(jnp.bfloat16), w2_ref[...],
                  preferred_element_type=jnp.float32)
    o_ref[...] = (out + b2_ref[...]).astype(o_ref.dtype)


# ---------------------------------------------------------------------------
# Fused single-kernel path (small/medium problems, everything fits in VMEM):
# h never leaves VMEM and there is one dispatch.
# ---------------------------------------------------------------------------
def _fused_mlp_kernel(x_ref, w1_ref, gamma_ref, beta_ref, w2_ref, b2_ref,
                      o_ref, *, inv_n):
    h = jnp.dot(x_ref[...], w1_ref[...], preferred_element_type=jnp.float32)
    # Padded batch rows of h are exactly zero (zero x rows, no bias) -> the
    # sums are already over the valid rows; divide by the true batch size.
    mean = jnp.sum(h, axis=0, keepdims=True) * inv_n
    ex2 = jnp.sum(h * h, axis=0, keepdims=True) * inv_n
    var = jnp.maximum(ex2 - mean * mean, 0.0)
    scale = jax.lax.rsqrt(var + BN_EPS) * gamma_ref[...]
    shift = beta_ref[...] - mean * scale
    hn = jnp.maximum(h * scale + shift, 0.0)
    out = jnp.dot(hn.astype(jnp.bfloat16), w2_ref[...],
                  preferred_element_type=jnp.float32)
    o_ref[...] = (out + b2_ref[...]).astype(o_ref.dtype)


# ---------------------------------------------------------------------------
# One-time parameter preparation (padding + bf16 cast happen once, not per
# forward call).
# ---------------------------------------------------------------------------
def prepare_params(w1, b1, gamma, beta, w2, b2):
    # b1 accepted for interface parity with the PyTorch module but unused:
    # train-mode BatchNorm makes the forward output invariant to it.
    del b1
    d, hidden = w1.shape
    proj = w2.shape[1]
    d_pad = _round_up(d, 128)
    h_pad = _round_up(hidden, 128)
    p_pad = _round_up(proj, 128)
    w1_p = jnp.zeros((d_pad, h_pad), jnp.float32).at[:d, :hidden].set(w1).astype(jnp.bfloat16)
    gamma_p = jnp.zeros((1, h_pad), jnp.float32).at[:, :hidden].set(gamma)
    beta_p = jnp.zeros((1, h_pad), jnp.float32).at[:, :hidden].set(beta)
    w2_p = jnp.zeros((h_pad, p_pad), jnp.float32).at[:hidden, :proj].set(w2).astype(jnp.bfloat16)
    b2_p = jnp.zeros((1, p_pad), jnp.float32).at[:, :proj].set(b2)
    return dict(w1=w1_p, gamma=gamma_p, beta=beta_p, w2=w2_p, b2=b2_p,
                dim=d, hidden=hidden, proj=proj,
                d_pad=d_pad, h_pad=h_pad, p_pad=p_pad)


def mlp_forward(x, prepped, *, block_rows=None, force_path=None):
    n, d = x.shape
    assert d == prepped["dim"]
    d_pad, h_pad, p_pad = prepped["d_pad"], prepped["h_pad"], prepped["p_pad"]
    proj = prepped["proj"]
    w1_p, gamma_p, beta_p = prepped["w1"], prepped["gamma"], prepped["beta"]
    w2_p, b2_p = prepped["w2"], prepped["b2"]

    cap = _tpu_vmem_capacity_bytes()
    vmem_limit = int(min(cap * 3 // 4, 100 * 1024 * 1024))
    if block_rows is None:
        # 512-row tiles on 128-MiB parts (v5e/v6e); 256 on v7x (64 MiB).
        block_rows = 512 if cap >= 128 * 1024 * 1024 else 256

    tm = block_rows if n >= block_rows else _round_up(n, 16)  # bf16 sublane packing
    n_pad = _round_up(n, tm)
    grid_n = n_pad // tm
    inv_n = 1.0 / float(n)

    # Pad/cast x only when needed (bf16 operands: same MXU precision as an
    # in-kernel cast, half the HBM read).
    x_p = x
    if x.shape != (n_pad, d_pad) or x.dtype != jnp.bfloat16:
        x_p = jnp.zeros((n_pad, d_pad), jnp.bfloat16).at[:n, :d].set(x.astype(jnp.bfloat16))

    # Rough VMEM footprint of the fused path (inputs + f32 h + bf16 hn + out).
    fused_bytes = (n_pad * d_pad * 2 + d_pad * h_pad * 2 + h_pad * p_pad * 2
                   + n_pad * h_pad * 6 + n_pad * p_pad * 4 + 16 * h_pad + 8 * p_pad)
    use_fused = (force_path == "fused"
                 or (force_path is None and fused_bytes * 2 <= vmem_limit))

    if use_fused:
        out_p = pl.pallas_call(
            functools.partial(_fused_mlp_kernel, inv_n=inv_n),
            out_shape=jax.ShapeDtypeStruct((n_pad, p_pad), jnp.float32),
            compiler_params=pltpu.CompilerParams(vmem_limit_bytes=vmem_limit),
            cost_estimate=pl.CostEstimate(
                flops=2 * n_pad * d_pad * h_pad + 2 * n_pad * h_pad * p_pad,
                transcendentals=h_pad,
                bytes_accessed=(2 * n_pad * d_pad + 2 * d_pad * h_pad
                                + 2 * h_pad * p_pad + 4 * n_pad * p_pad
                                + 8 * h_pad + 4 * p_pad),
            ),
        )(x_p, w1_p, gamma_p, beta_p, w2_p, b2_p)
        return out_p[:n, :proj]

    cparams = pltpu.CompilerParams(
        dimension_semantics=("parallel",),   # batch tiles shard across v7x TCs
        vmem_limit_bytes=vmem_limit,
    )

    # ---- Pass 1: Linear1 (no bias) + per-tile BN partial statistics ----
    h_full, psum, psq = pl.pallas_call(
        _linear1_stats_kernel,
        out_shape=(
            jax.ShapeDtypeStruct((n_pad, h_pad), jnp.bfloat16),
            jax.ShapeDtypeStruct((grid_n, 1, h_pad), jnp.float32),
            jax.ShapeDtypeStruct((grid_n, 1, h_pad), jnp.float32),
        ),
        grid=(grid_n,),
        in_specs=[
            pl.BlockSpec((tm, d_pad), lambda i: (i, 0)),
            pl.BlockSpec((d_pad, h_pad), lambda i: (0, 0)),   # W1 resident
        ],
        out_specs=(
            pl.BlockSpec((tm, h_pad), lambda i: (i, 0)),
            pl.BlockSpec((1, 1, h_pad), lambda i: (i, 0, 0)),
            pl.BlockSpec((1, 1, h_pad), lambda i: (i, 0, 0)),
        ),
        compiler_params=cparams,
        cost_estimate=pl.CostEstimate(
            flops=2 * n_pad * d_pad * h_pad,
            transcendentals=0,
            bytes_accessed=(2 * n_pad * d_pad + 2 * d_pad * h_pad
                            + 2 * n_pad * h_pad + 8 * grid_n * h_pad),
        ),
    )(x_p, w1_p)

    # ---- Pass 2: in-kernel stats combine + BN FMA + ReLU + Linear2 ----
    out_p = pl.pallas_call(
        functools.partial(_bn_relu_linear2_kernel, inv_n=inv_n),
        out_shape=jax.ShapeDtypeStruct((n_pad, p_pad), jnp.float32),
        grid=(grid_n,),
        in_specs=[
            pl.BlockSpec((grid_n, 1, h_pad), lambda i: (0, 0, 0)),
            pl.BlockSpec((grid_n, 1, h_pad), lambda i: (0, 0, 0)),
            pl.BlockSpec((1, h_pad), lambda i: (0, 0)),
            pl.BlockSpec((1, h_pad), lambda i: (0, 0)),
            pl.BlockSpec((tm, h_pad), lambda i: (i, 0)),
            pl.BlockSpec((h_pad, p_pad), lambda i: (0, 0)),   # W2 resident
            pl.BlockSpec((1, p_pad), lambda i: (0, 0)),
        ],
        out_specs=pl.BlockSpec((tm, p_pad), lambda i: (i, 0)),
        compiler_params=cparams,
        cost_estimate=pl.CostEstimate(
            flops=2 * n_pad * h_pad * p_pad,
            transcendentals=grid_n * h_pad,
            bytes_accessed=(2 * n_pad * h_pad + 2 * h_pad * p_pad
                            + 4 * n_pad * p_pad + 8 * grid_n * h_pad
                            + 12 * h_pad + 4 * p_pad),
        ),
    )(psum, psq, gamma_p, beta_p, h_full, w2_p, b2_p)

    return out_p[:n, :proj]


# ---------------------------------------------------------------------------
# Parameters and references
# ---------------------------------------------------------------------------
def init_params(key, dim, hidden, projection):
    k1, k2, k3, k4 = jax.random.split(key, 4)
    w1 = jax.random.uniform(k1, (dim, hidden), jnp.float32, -1.0, 1.0) / jnp.sqrt(dim)
    b1 = jax.random.uniform(k2, (1, hidden), jnp.float32, -1.0, 1.0) / jnp.sqrt(dim)
    gamma = jnp.ones((1, hidden), jnp.float32)
    beta = jnp.zeros((1, hidden), jnp.float32)
    w2 = jax.random.uniform(k3, (hidden, projection), jnp.float32, -1.0, 1.0) / jnp.sqrt(hidden)
    b2 = jax.random.uniform(k4, (1, projection), jnp.float32, -1.0, 1.0) / jnp.sqrt(hidden)
    return w1, b1, gamma, beta, w2, b2


def reference_f32(x, w1, b1, gamma, beta, w2, b2):
    """Full-f32 math, mirrors the PyTorch module (train-mode BN) exactly."""
    h = x @ w1 + b1
    mean = jnp.mean(h, axis=0, keepdims=True)
    var = jnp.mean((h - mean) ** 2, axis=0, keepdims=True)
    h = (h - mean) * jax.lax.rsqrt(var + BN_EPS) * gamma + beta
    h = jnp.maximum(h, 0.0)
    return h @ w2 + b2


def reference_mxu(x, w1, gamma, beta, w2, b2, *, bf16_h):
    """Precision-matched reference: bf16 MXU operands / f32 accumulate, no b1
    (train-mode BN is invariant to it), optional bf16 round-trip of h that
    models the two-pass kernel's bf16 intermediate storage."""
    h = jnp.dot(x.astype(jnp.bfloat16), w1.astype(jnp.bfloat16),
                preferred_element_type=jnp.float32)
    mean = jnp.mean(h, axis=0, keepdims=True)
    var = jnp.maximum(jnp.mean(h * h, axis=0, keepdims=True) - mean * mean, 0.0)
    if bf16_h:
        h = h.astype(jnp.bfloat16).astype(jnp.float32)
    h = (h - mean) * jax.lax.rsqrt(var + BN_EPS) * gamma + beta
    h = jnp.maximum(h, 0.0)
    return jnp.dot(h.astype(jnp.bfloat16), w2.astype(jnp.bfloat16),
                   preferred_element_type=jnp.float32) + b2


if __name__ == "__main__":
    key = jax.random.PRNGKey(0)
    kx, kp = jax.random.split(key)

    # Small shapes; batch deliberately NOT a multiple of the row tile so padded
    # batch rows and the cross-tile BN statistics path get exercised.
    batch, dim, hidden, projection = 20, 32, 64, 16
    x = jax.random.normal(kx, (batch, dim), jnp.float32)
    params = init_params(kp, dim, hidden, projection)
    w1, b1, gamma, beta, w2, b2 = params
    prepped = prepare_params(*params)

    # Two-pass tiled path: 2 batch tiles of 16 rows.
    out_2p = jax.block_until_ready(
        mlp_forward(x, prepped, block_rows=16, force_path="two_pass"))
    # Fully fused single-kernel path (h stays in VMEM).
    out_f = jax.block_until_ready(mlp_forward(x, prepped, force_path="fused"))

    assert out_2p.shape == (batch, projection)
    assert out_f.shape == (batch, projection)

    # Tight checks vs precision-matched references.
    ref_2p = reference_mxu(x, w1, gamma, beta, w2, b2, bf16_h=True)
    ref_f = reference_mxu(x, w1, gamma, beta, w2, b2, bf16_h=False)
    assert jnp.allclose(out_2p, ref_2p, atol=3e-3, rtol=3e-3), \
        float(jnp.max(jnp.abs(out_2p - ref_2p)))
    assert jnp.allclose(out_f, ref_f, atol=3e-3, rtol=3e-3), \
        float(jnp.max(jnp.abs(out_f - ref_f)))

    # Loose sanity check vs exact full-f32 module math (bf16 MXU operands and
    # the bf16 intermediate are intentional precision/throughput tradeoffs).
    ref_full = reference_f32(x, *params)
    for out in (out_2p, out_f):
        assert jnp.allclose(out, ref_full, atol=1.5e-1, rtol=1.5e-1), \
            float(jnp.max(jnp.abs(out - ref_full)))

    print("KERNEL_OK")
</pallas_src>

<mosaic_0001>
module attributes {stable_mosaic.version = 11 : i64} {
  func.func @_linear1_stats_kernel(%arg0: i32, %arg1: memref<16x128xbf16, #tpu.memory_space<vmem>>, %arg2: memref<128x128xbf16, #tpu.memory_space<vmem>>, %arg3: memref<16x128xbf16, #tpu.memory_space<vmem>>, %arg4: memref<1x1x128xf32, #tpu.memory_space<vmem>>, %arg5: memref<1x1x128xf32, #tpu.memory_space<vmem>>) attributes {dimension_semantics = [#tpu.dimension_semantics<parallel>], iteration_bounds = array<i64: 2>, scalar_prefetch = 0 : i64, scratch_operands = 0 : i64, tpu.core_type = #tpu.core_type<tc>, window_params = [{transform_indices = @transform_0, window_bounds = array<i64: 16, 128>}, {pipeline_mode = #tpu.pipeline_mode<synchronous>, transform_indices = @transform_1, window_bounds = array<i64: 128, 128>}, {transform_indices = @transform_2, window_bounds = array<i64: 16, 128>}, {transform_indices = @transform_3, window_bounds = array<i64: 1, 1, 128>}, {transform_indices = @transform_4, window_bounds = array<i64: 1, 1, 128>}]} {
    %c0 = arith.constant 0 : index
    %c0_0 = arith.constant 0 : index
    %0 = vector.load %arg1[%c0, %c0_0] : memref<16x128xbf16, #tpu.memory_space<vmem>>, vector<16x128xbf16>
    %c0_1 = arith.constant 0 : index
    %c0_2 = arith.constant 0 : index
    %1 = vector.load %arg2[%c0_1, %c0_2] : memref<128x128xbf16, #tpu.memory_space<vmem>>, vector<128x128xbf16>
    %cst = arith.constant dense<0.000000e+00> : vector<16x128xf32>
    %2 = tpu.matmul %0, %1, %cst {dimension_numbers = #tpu.dot_dimension_numbers<[1], [0], [0], [1], [0, 0, 1, 1], [], []>} : vector<16x128xbf16>, vector<128x128xbf16>, vector<16x128xf32> -> vector<16x128xf32>
    %3 = arith.truncf %2 : vector<16x128xf32> to vector<16x128xbf16>
    %c0_3 = arith.constant 0 : index
    %c0_4 = arith.constant 0 : index
    %4 = vector.load %arg3[%c0_3, %c0_4] : memref<16x128xbf16, #tpu.memory_space<vmem>>, vector<16x128xbf16>
    tpu.vector_store %arg3[%c0_3, %c0_4], %3 {strides = array<i32>} : memref<16x128xbf16, #tpu.memory_space<vmem>>, vector<16x128xbf16>,
    %cst_5 = arith.constant dense<0.000000e+00> : vector<128xf32>
    %5 = vector.multi_reduction <add>, %2, %cst_5 [0] : vector<16x128xf32> to vector<128xf32>
    %6 = vector.shape_cast %5 : vector<128xf32> to vector<1x128xf32>
    %7 = vector.shape_cast %6 : vector<1x128xf32> to vector<1x1x128xf32>
    %c0_6 = arith.constant 0 : index
    %c0_7 = arith.constant 0 : index
    %c0_8 = arith.constant 0 : index
    %8 = vector.load %arg4[%c0_6, %c0_7, %c0_8] : memref<1x1x128xf32, #tpu.memory_space<vmem>>, vector<1x1x128xf32>
    tpu.vector_store %arg4[%c0_6, %c0_7, %c0_8], %7 {strides = array<i32>} : memref<1x1x128xf32, #tpu.memory_space<vmem>>, vector<1x1x128xf32>,
    %9 = arith.mulf %2, %2 : vector<16x128xf32>
    %cst_9 = arith.constant dense<0.000000e+00> : vector<128xf32>
    %10 = vector.multi_reduction <add>, %9, %cst_9 [0] : vector<16x128xf32> to vector<128xf32>
    %11 = vector.shape_cast %10 : vector<128xf32> to vector<1x128xf32>
    %12 = vector.shape_cast %11 : vector<1x128xf32> to vector<1x1x128xf32>
    %c0_10 = arith.constant 0 : index
    %c0_11 = arith.constant 0 : index
    %c0_12 = arith.constant 0 : index
    %13 = vector.load %arg5[%c0_10, %c0_11, %c0_12] : memref<1x1x128xf32, #tpu.memory_space<vmem>>, vector<1x1x128xf32>
    tpu.vector_store %arg5[%c0_10, %c0_11, %c0_12], %12 {strides = array<i32>} : memref<1x1x128xf32, #tpu.memory_space<vmem>>, vector<1x1x128xf32>,
    return
  }
  func.func @transform_0(%arg0: i32) -> (i32, i32) {
    %c0_i32 = arith.constant 0 : i32
    %c0_i32_0 = arith.constant 0 : i32
    return %arg0, %c0_i32 : i32, i32
  }
  func.func @transform_1(%arg0: i32) -> (i32, i32) {
    %c0_i32 = arith.constant 0 : i32
    %c0_i32_0 = arith.constant 0 : i32
    %c0_i32_1 = arith.constant 0 : i32
    return %c0_i32, %c0_i32_0 : i32, i32
  }
  func.func @transform_2(%arg0: i32) -> (i32, i32) {
    %c0_i32 = arith.constant 0 : i32
    %c0_i32_0 = arith.constant 0 : i32
    return %arg0, %c0_i32 : i32, i32
  }
  func.func @transform_3(%arg0: i32) -> (i32, i32, i32) {
    %c0_i32 = arith.constant 0 : i32
    %c0_i32_0 = arith.constant 0 : i32
    %c0_i32_1 = arith.constant 0 : i32
    return %arg0, %c0_i32, %c0_i32_0 : i32, i32, i32
  }
  func.func @transform_4(%arg0: i32) -> (i32, i32, i32) {
    %c0_i32 = arith.constant 0 : i32
    %c0_i32_0 = arith.constant 0 : i32
    %c0_i32_1 = arith.constant 0 : i32
    return %arg0, %c0_i32, %c0_i32_0 : i32, i32, i32
  }
}

</mosaic_0001>

<bundles_post_ra>
// kernel: tpu_custom_call.1
= control target key start
LH: loop header
LB: loop body
LE: loop exit
PB: predicated region body
PF: predicated region fallthrough
CT: control target
= control target key end

     0   :  { %10 = vsyncpa [#allocation3], 0  ;;  %s1236_s0 = inlined_call_operand.hbm [shape: bf16[32,128], index: 0, kind: input, shape index: {}]   ;;  %s1237_s1 = inlined_call_operand.hbm [shape: bf16[128,128], index: 1, kind: input, shape index: {}]   ;;  %s1238_s2 = inlined_call_operand.hbm [shape: bf16[32,128], index: 2, kind: output, shape index: {0}]   ;;  %s1239_s3 = inlined_call_operand.hbm [shape: f32[2,1,128], index: 3, kind: output, shape index: {1}]   ;;  %s1240_s4 = inlined_call_operand.hbm [shape: f32[2,1,128], index: 4, kind: output, shape index: {2}]  }
   0x1   :  { %12 = vsyncpa [#allocation3 + $0x1], 0 }
   0x2   :  { %13 = vsyncpa [#allocation6], 0 }
   0x3   :  { %14 = vsyncpa [#allocation4], 0 }
   0x4   :  { %16 = vsyncpa [#allocation4 + $0x1], 0 }
   0x5   :  { %17 = vsyncpa [#allocation9], 0 }
   0x6   :  { %19 = vsyncpa [#allocation9 + $0x1], 0  ;;  %s950_s15 = smov 0   ;;  %s952_s16 = smov 0  }
   0x7   :  { %s954_s17 = smov 0   ;;  %s956_s18 = smov 0  }
   0x8 LB: > { %s971_s19 = sadd.s32 4294967295, %s912_s18   ;;  %s575_s20 = sadd.s32 4294967294, %s912_s18   ;;  %s912_s18 = sphi %s956_s18, %s1260_s18   ;;  %s908_s17 = sphi %s954_s17, %s1259_s17   ;;  %s904_s16 = sphi %s952_s16, %s1258_s16   ;;  %s900_s15 = sphi %s950_s15, %s1257_s15  }
   0x9   : > { %p45_p0 = scmp.ne.s32.totalorder %s904_s16, %s900_s15  ;;  %p1241_p1 = scmp.eq.s32.totalorder %s971_s19, 0 }
   0xa   : > { %p96_p3 = scmp.eq.s32.totalorder %s575_s20, 1  ;;  %p576_p5 = scmp.ge.s32.totalorder %s912_s18, 1 }
   0xb   : > { %p982_p4 = por %p1241_p1, %p45_p0  ;;  %p155_p7 = scmp.lt.s32.totalorder %s912_s18, 3 }
   0xc   : > { %p987_p6 = por %p96_p3, %p45_p0  ;;  %s914_s24 = smov [#allocation5]  }
   0xd   : > { %s1244_s21 = scalar_select %p982_p4, 1, 0 }
   0xe   : > { %s1245_s22 = scalar_select %p987_p6, 1, 0 }
   0xf   : > { %p992_p8 = pnand %p576_p5, %p155_p7  ;;  %s167_s25 = sshll.u32 %s914_s24, 4  ;;  %s996_s25 = int_to_ptr.vmem [resolvable:$true] %s167_s25 }
  0x10   : > { %s1008_s27 = sadd.s32 1, %s912_s18   ;;  %s32_s28 = sadd.s32 1, %s908_s17 }
  0x11   : > { %s1246_s23 = scalar_select %p992_p8, 1, 0 }
  0x12   : > { %p654_p9 = pneg %p992_p8  ;;  %s29_s29 = ssub.s32 %s912_s18, %s1008_s27 }
  0x13   : > { %s724_s6 = scalar_lea.hbm %s1237_s1, 1024 }
  0x14   : > { %p1003_p11 = pnand %p654_p9, %p1241_p1  ;;  %p725_p12 = scmp.ne.s32.totalorder %s1237_s1, %s724_s6 }
  0x15   : > { %p731_p5 = scmp.lt.u32.totalorder %s724_s6, %s1237_s1 }
  0x16   : > { %p726_p13 = pneg %p1003_p11 }
  0x18   : > { %p727_p0 = pnand %p726_p13, %p725_p12 }
  0x1a   : > { %p728_p3 = pneg %p727_p0 }
  0x1c   : > { %p733_p7 = pnand %p731_p5, %p728_p3 }
  0x1e   : > { %736 = shalt.err (!%p733_p7)
}
  0x1f   : > { %s737_s11 = scalar_lea.vmem %s996_s25, 1024  ;;  %p745_p2 = scmp.lt.s32.totalorder %s996_s25, %s996_s25 }
  0x20   : > { %p738_p9 = scmp.ne.s32.totalorder %s996_s25, %s737_s11  ;;  %p746_p6 = scmp.lt.s32.totalorder %s737_s11, %s737_s11 }
  0x22   : > { %p740_p10 = pnand %p738_p9, %p726_p13  ;;  %p747_p4 = por %p746_p6, %p745_p2 }
  0x24   : > { %p741_p1 = pneg %p740_p10 }
  0x26   : > { %p748_p8 = pnand %p747_p4, %p741_p1 }
  0x28   : > { %751 = shalt.err (!%p748_p8)
}
  0x29   : > { %s915_s12 = smov 64   ;;  %s916_s13 = smov 4  }
  0x2a   : > { %657 = dma.hbm_to_vmem [thread:$0]  (!%p1003_p11), %s1237_s1, 1024, %s996_s25, [#allocation6], %s915_s12, %s915_s12, %s916_s13  }
  0x2b   : > { %p30_p1 = scmp.eq.s32.totalorder %s29_s29, 0  ;;  %p39_p2 = scmp.ne.s32.totalorder %s908_s17, %s904_s16 }
  0x2c   : > { %p40_p4 = scmp.eq.s32.totalorder %s912_s18, 0  ;;  %p673_p6 = scmp.lt.s32.totalorder %s912_s18, 2 }
  0x2d   : > { %s1042_s30 = scalar_select %p30_p1, %s908_s17, %s32_s28  }
  0x2e   : > { %p41_p8 = por %p40_p4, %p39_p2  ;;  %p1248_p10 = scmp.eq.s32.totalorder %s971_s19, 1 }
  0x2f   : > { %s181_s26 = sand.u32 1, %s908_s17   ;;  %s604_s6 = sshll.u32 %s912_s18, 7 }
  0x30   : > { %p1046_p12 = por %p1248_p10, %p39_p2  ;;  %s579_s7 = sshll.u32 %s181_s26, 3 }
  0x31   : > { %s1055_s10 = scalar_lea.hbm %s1236_s0, %s604_s6  ;;  %s185_s25 = scalar_lea.vmem [#allocation2], %s579_s7 }
  0x32   : > { %s192_s28 = sshll.u32 %s185_s25, 4  ;;  %p1057_p11 = pnand %p673_p6, %p41_p8  ;;  %s1061_s28 = int_to_ptr.vmem [resolvable:$true] %s192_s28 }
  0x33   : > { %s1063_s11 = scalar_lea.sflag [#allocation3], %s181_s26  ;;  %s752_s14 = scalar_lea.hbm %s1055_s10, 128 }
  0x34   : > { %p753_p13 = scmp.ne.s32.totalorder %s1055_s10, %s752_s14  ;;  %p754_p0 = pneg %p1057_p11 }
  0x35   : > { %s757_s7 = scalar_lea.hbm %s1236_s0, 256  ;;  %p758_p7 = scmp.lt.u32.totalorder %s1055_s10, %s1236_s0 }
  0x36   : > { %p755_p3 = pnand %p754_p0, %p753_p13  ;;  %p759_p9 = scmp.lt.u32.totalorder %s757_s7, %s752_s14 }
  0x37   : > { %p761_p2 = scmp.lt.u32.totalorder %s752_s14, %s1055_s10 }
  0x38   : > { %p756_p5 = pneg %p755_p3  ;;  %p760_p1 = por %p759_p9, %p758_p7 }
  0x3a   : > { %p762_p4 = por %p761_p2, %p760_p1 }
  0x3c   : > { %p763_p6 = pnand %p762_p4, %p756_p5 }
  0x3e   : > { %766 = shalt.err (!%p763_p6)
}
  0x3f   : > { %s767_s26 = scalar_lea.vmem %s1061_s28, 128  ;;  %s917_s25 = smov [#allocation2]  }
  0x40   : > { %p768_p8 = scmp.ne.s32.totalorder %s1061_s28, %s767_s26  ;;  %s772_s24 = sshll.u32 %s917_s25, 4  ;;  %s773_s24 = int_to_ptr.vmem [resolvable:$false] %s772_s24 }
  0x41   : > { %s774_s6 = scalar_lea.vmem %s773_s24, 256  ;;  %p775_p3 = scmp.lt.s32.totalorder %s1061_s28, %s773_s24 }
  0x42   : > { %p770_p10 = pnand %p768_p8, %p754_p0  ;;  %p776_p7 = scmp.lt.s32.totalorder %s774_s6, %s767_s26 }
  0x44   : > { %p771_p13 = pneg %p770_p10  ;;  %p777_p9 = por %p776_p7, %p775_p3 }
  0x46   : > { %p778_p1 = pnand %p777_p9, %p771_p13 }
  0x48   : > { %781 = shalt.err (!%p778_p1)
}
  0x49   : > { %661 = dma.hbm_to_vmem [thread:$0]  (!%p1057_p11), %s1055_s10, 128, %s1061_s28, %s1063_s11, %s915_s12, %s915_s12, %s916_s13  }
  0x4a   : > { %p1251_p0 = scmp.ne.s32.totalorder %s1246_s23, 0 }
  0x4b   : > { %s1097_s14 = sand.u32 (!%p1251_p0), 1, %s904_s16   ;;  %p1252_p5 = scmp.ne.s32.totalorder (!%p1251_p0), %s1244_s21, 0 }
  0x4c   : > { %204 = sbr.rel (%p1251_p0) target bundleno = 400 (0x190), region = 28  ;;  %s583_s7 = sshll.u32 (!%p1251_p0), %s1097_s14, 3 }
  0x4d   : > { %s207_s8 = scalar_lea.sflag (!%p1251_p0), [#allocation3], %s1097_s14  ;;  %s1103_s29 = scalar_lea.vmem (!%p1251_p0), [#allocation2], %s583_s7 }
  0x53   : > { %883 = dma.done.wait (%p1252_p5), %s207_s8, 128  }
  0x54   : > { %885 = vsyncadd (%p1252_p5), %s207_s8, 4294967168  ;;  %p1253_p11 = scmp.eq.s32.totalorder %s971_s19, 0 }
  0x56   : > { %887 = dma.done.wait (%p1253_p11), [#allocation6], 1024   ;;  %p1254_p2 = pmov %p1253_p11 }
  0x57   : > { %v918_v0 = vmov 0.0   ;;  %vm919_vm0 = vmmov 0   ;;  %v715_v1 = vld [vmem:[#allocation5] sm:$0xff]   ;;  %v716_v2 = vld [vmem:[#allocation5 + $0x8] sm:$0xff]   ;;  %v717_v3 = vld [vmem:[#allocation5 + $0x10] sm:$0xff]   ;;  %s234_s21 = scalar_lea.vmem [#allocation7], %s583_s7 }
  0x58   : > { %889 = vsyncadd (%p1254_p2), [#allocation6], 4294966272  ;;  %622 = vmatprep.subr.bf16.mxu0 %v918_v0  ;;  %638 = vmatprep.mubr.msk.bf16.mxu0 %vm919_vm0, %v918_v0  ;;  %v718_v4 = vld [vmem:[#allocation5 + $0x18] sm:$0xff]   ;;  %v719_v5 = vld [vmem:[#allocation5 + $0x20] sm:$0xff]   ;;  %s413_s23 = sshll.u32 %s234_s21, 4  ;;  %s607_s12 = sshll.u32 %s971_s19, 7  ;;  %s1117_s23 = int_to_ptr.vmem [resolvable:$true] %s413_s23 }
  0x59   : > { %623 = vmatpush3.bf16.msra.mxu0 %v715_v1  ;;  %v720_v6 = vld [vmem:[#allocation5 + $0x28] sm:$0xff]   ;;  %v721_v7 = vld [vmem:[#allocation5 + $0x30] sm:$0xff]   ;;  %v722_v8 = vld [vmem:[#allocation5 + $0x38] sm:$0xff]   ;;  %s1122_s28 = scalar_lea.hbm %s1238_s2, %s607_s12  ;;  %s392_s11 = scalar_lea.sflag [#allocation4], %s1097_s14 }
  0x5a   : > { %624 = vmatprep.subr.bf16.mxu0 %v918_v0  ;;  %v723_v9 = vld [vmem:[%s1103_s29] sm:$0xff]   ;;  %s782_s9 = scalar_lea.vmem %s1117_s23, 128  ;;  %s920_s26 = smov [#allocation7]  }
  0x5b   : > { %p783_p4 = scmp.ne.s32.totalorder %s1117_s23, %s782_s9  ;;  %s786_s25 = sshll.u32 %s920_s26, 4  ;;  %s787_s25 = int_to_ptr.vmem [resolvable:$false] %s786_s25 }
  0x5c   : > { %s788_s24 = scalar_lea.vmem %s787_s25, 256  ;;  %p789_p10 = scmp.lt.s32.totalorder %s1117_s23, %s787_s25 }
  0x5d   : > { %625 = vmatpush3.bf16.msra.mxu0 %v716_v2  ;;  %p784_p6 = pnand %p783_p4, %p1046_p12  ;;  %p790_p13 = scmp.lt.s32.totalorder %s788_s24, %s782_s9 }
  0x5e   : > { %626 = vmatprep.subr.bf16.mxu0 %v918_v0 }
  0x5f   : > { %p785_p8 = pneg %p784_p6  ;;  %p791_p3 = por %p790_p13, %p789_p10 }
  0x61   : > { %627 = vmatpush3.bf16.msra.mxu0 %v717_v3  ;;  %p792_p7 = pnand %p791_p3, %p785_p8 }
  0x62   : > { %628 = vmatprep.subr.bf16.mxu0 %v918_v0 }
  0x65   : > { %629 = vmatpush3.bf16.msra.mxu0 %v718_v4 }
  0x66   : > { %630 = vmatprep.subr.bf16.mxu0 %v918_v0 }
  0x69   : > { %631 = vmatpush3.bf16.msra.mxu0 %v719_v5 }
  0x6a   : > { %632 = vmatprep.subr.bf16.mxu0 %v918_v0 }
  0x6d   : > { %633 = vmatpush3.bf16.msra.mxu0 %v720_v6 }
  0x6e   : > { %634 = vmatprep.subr.bf16.mxu0 %v918_v0 }
  0x71   : > { %635 = vmatpush3.bf16.msra.mxu0 %v721_v7 }
  0x72   : > { %636 = vmatprep.subr.bf16.mxu0 %v918_v0 }
  0x75   : > { %637 = vmatpush3.bf16.msra.mxu0 %v722_v8 }
  0x78   : > { %639 = vmatmul.mubr.bf16.vlgmr.msra.gmra.mrb[0].mxu0 %v723_v9 }
 0x14b   : > { %v356_v10 = vpop.f32.mrb[0].mxu0 }
 0x14c   : > { %v640_v11 = vpop.f32.mrb[1].mxu0  ;;  %v381_v13 = vmul.f32 %v356_v10, %v356_v10 }
 0x14d   : > { %v359_v12 = vpop.f32.mrb[2].mxu0 }
 0x14e   : > { %v611_v14 = vpack.c.bf16 %v359_v12, %v356_v10  ;;  %v373_v15 = vadd.f32 %v359_v12, %v356_v10  ;;  %v382_v16 = vmul.f32 %v359_v12, %v359_v12  ;;  %v641_v17 = vpop.f32.mrb[3].mxu0 }
 0x150   : > { %612 = vst [vmem:[%s234_s21] sm:$0xff] %v611_v14   ;;  %v374_v18 = vrot.slane %v373_v15, 4  ;;  %v383_v19 = vadd.f32 %v382_v16, %v381_v13 }
 0x151   : > { %795 = shalt.err (!%p792_p7)
}
 0x152   : > { %s796_s6 = scalar_lea.hbm %s1122_s28, 128  ;;  %s800_s29 = scalar_lea.hbm %s1238_s2, 256 }
 0x153   : > { %p797_p9 = scmp.ne.s32.totalorder %s1122_s28, %s796_s6  ;;  %p801_p5 = scmp.lt.u32.totalorder %s1122_s28, %s1238_s2 }
 0x154   : > { %p802_p11 = scmp.lt.u32.totalorder %s800_s29, %s796_s6  ;;  %p804_p4 = scmp.lt.u32.totalorder %s796_s6, %s1122_s28 }
 0x155   : > { %p798_p1 = pnand %p797_p9, %p1046_p12 }
 0x156   : > { %p803_p2 = por %p802_p11, %p801_p5 }
 0x157   : > { %p799_p0 = pneg %p798_p1 }
 0x158   : > { %p805_p6 = por %p804_p4, %p803_p2 }
 0x15a   : > { %p806_p8 = pnand %p805_p6, %p799_p0 }
 0x15c   : > { %809 = shalt.err (!%p806_p8)
}
 0x15d   : > { %s921_s13 = smov 64   ;;  %s922_s10 = smov 4   ;;  %v375_v20 = vadd.f32 %v374_v18, %v373_v15  ;;  %v384_v21 = vrot.slane %v383_v19, 4 }
 0x15e   : > { %648 = dma.vmem_to_hbm [thread:$0]  (%p1046_p12), %s1117_s23, 128, %s1122_s28, %s392_s11, %s921_s13, %s921_s13, %s922_s10  }
 0x15f   : > { %v376_v22 = vrot.slane %v375_v20, 2  ;;  %v385_v23 = vadd.f32 %v384_v21, %v383_v19  ;;  %s396_s9 = sand.u32 1, %s971_s19   ;;  %s600_s26 = sshll.u32 %s971_s19, 4 }
 0x160   : > { %s240_s25 = scalar_lea.vmem [#allocation8], %s1097_s14  ;;  %s246_s6 = scalar_lea.vmem [#allocation10], %s1097_s14 }
 0x161   : > { %v377_v24 = vadd.f32 %v376_v22, %v375_v20  ;;  %v386_v25 = vrot.slane %v385_v23, 2  ;;  %s429_s24 = sshll.u32 %s240_s25, 4  ;;  %s442_s7 = sshll.u32 %s246_s6, 4  ;;  %s1159_s24 = int_to_ptr.vmem [resolvable:$true] %s429_s24  ;;  %s1166_s7 = int_to_ptr.vmem [resolvable:$true] %s442_s7 }
 0x162   : > { %s1157_s28 = scalar_lea.hbm %s1239_s3, %s600_s26  ;;  %s1164_s29 = scalar_lea.hbm %s1240_s4, %s600_s26 }
 0x163   : > { %v378_v26 = vrot.slane %v377_v24, 1  ;;  %v387_v27 = vadd.f32 %v386_v25, %v385_v23  ;;  %s1168_s21 = scalar_lea.sflag [#allocation9], %s396_s9  ;;  %s810_s12 = scalar_lea.vmem %s1159_s24, 16 }
 0x164   : > { %p811_p10 = scmp.ne.s32.totalorder %s1159_s24, %s810_s12  ;;  %s923_s13 = smov [#allocation8]  }
 0x165   : > { %v379_v28 = vadd.f32 %v378_v26, %v377_v24  ;;  %v388_v29 = vrot.slane %v387_v27, 1  ;;  %s814_s10 = sshll.u32 %s923_s13, 4  ;;  %s815_s10 = int_to_ptr.vmem [resolvable:$false] %s814_s10 }
 0x166   : > { %p812_p13 = pnand %p811_p10, %p1046_p12  ;;  %s816_s8 = scalar_lea.vmem %s815_s10, 32 }
 0x167   : > { %v389_v30 = vadd.f32 %v388_v29, %v387_v27  ;;  %380 = vst [vmem:[%s240_s25] sm:$0x1] %v379_v28  ;;  %p817_p7 = scmp.lt.s32.totalorder %s1159_s24, %s815_s10  ;;  %p818_p9 = scmp.lt.s32.totalorder %s816_s8, %s810_s12 }
 0x168   : > { %p813_p3 = pneg %p812_p13 }
 0x169   : > { %p819_p1 = por %p818_p9, %p817_p7 }
 0x16b   : > { %p820_p0 = pnand %p819_p1, %p813_p3 }
 0x16d   : > { %823 = shalt.err (!%p820_p0)
}
 0x16e   : > { %s824_s9 = scalar_lea.hbm %s1157_s28, 16  ;;  %s828_s23 = scalar_lea.hbm %s1239_s3, 32 }
 0x16f   : > { %p825_p5 = scmp.ne.s32.totalorder %s1157_s28, %s824_s9  ;;  %p829_p4 = scmp.lt.u32.totalorder %s1157_s28, %s1239_s3 }
 0x170   : > { %p830_p6 = scmp.lt.u32.totalorder %s828_s23, %s824_s9  ;;  %p832_p10 = scmp.lt.u32.totalorder %s824_s9, %s1157_s28 }
 0x171   : > { %p826_p11 = pnand %p825_p5, %p1046_p12 }
 0x172   : > { %p831_p8 = por %p830_p6, %p829_p4 }
 0x173   : > { %p827_p2 = pneg %p826_p11 }
 0x174   : > { %p833_p13 = por %p832_p10, %p831_p8 }
 0x176   : > { %p834_p3 = pnand %p833_p13, %p827_p2 }
 0x178   : > { %837 = shalt.err (!%p834_p3)
}
 0x179   : > { %649 = dma.vmem_to_hbm [thread:$0]  (%p1046_p12), %s1159_s24, 16, %s1157_s28, %s1168_s21   ;;  %390 = vst [vmem:[%s246_s6] sm:$0x1] %v389_v30 }
 0x17a   : > { %s838_s12 = scalar_lea.vmem %s1166_s7, 16  ;;  %s924_s13 = smov [#allocation10]  }
 0x17b   : > { %p839_p7 = scmp.ne.s32.totalorder %s1166_s7, %s838_s12  ;;  %s842_s10 = sshll.u32 %s924_s13, 4  ;;  %s843_s10 = int_to_ptr.vmem [resolvable:$false] %s842_s10 }
 0x17c   : > { %s844_s8 = scalar_lea.vmem %s843_s10, 32  ;;  %p845_p0 = scmp.lt.s32.totalorder %s1166_s7, %s843_s10 }
 0x17d   : > { %p840_p9 = pnand %p839_p7, %p1046_p12  ;;  %p846_p5 = scmp.lt.s32.totalorder %s844_s8, %s838_s12 }
 0x17f   : > { %p841_p1 = pneg %p840_p9  ;;  %p847_p11 = por %p846_p5, %p845_p0 }
 0x181   : > { %p848_p2 = pnand %p847_p11, %p841_p1 }
 0x183   : > { %851 = shalt.err (!%p848_p2)
}
 0x184   : > { %s852_s14 = scalar_lea.hbm %s1164_s29, 16  ;;  %s856_s28 = scalar_lea.hbm %s1240_s4, 32 }
 0x185   : > { %p853_p4 = scmp.ne.s32.totalorder %s1164_s29, %s852_s14  ;;  %p857_p10 = scmp.lt.u32.totalorder %s1164_s29, %s1240_s4 }
 0x186   : > { %p858_p13 = scmp.lt.u32.totalorder %s856_s28, %s852_s14  ;;  %p860_p7 = scmp.lt.u32.totalorder %s852_s14, %s1164_s29 }
 0x187   : > { %p854_p6 = pnand %p853_p4, %p1046_p12 }
 0x188   : > { %p859_p3 = por %p858_p13, %p857_p10 }
 0x189   : > { %p855_p8 = pneg %p854_p6 }
 0x18a   : > { %p861_p9 = por %p860_p7, %p859_p3 }
 0x18c   : > { %p862_p1 = pnand %p861_p9, %p855_p8 }
 0x18e   : > { %865 = shalt.err (!%p862_p1)
}
 0x18f   : > { %650 = dma.vmem_to_hbm [thread:$0]  (%p1046_p12), %s1166_s7, 16, %s1164_s29, %s1168_s21  }
 0x190 PF: > { %s454_s25 = sand.u32 1, %s900_s15   ;;  %p1255_p0 = scmp.ne.s32.totalorder %s1245_s22, 0 }
 0x191   : > { %p1256_p5 = scmp.ge.s32.totalorder %s912_s18, 2  ;;  %s455_s23 = scalar_lea.sflag [#allocation4], %s454_s25 }
 0x193   : > { %p663_p11 = pnand %p1256_p5, %p1255_p0 }
 0x195   : > { %891 = dma.done.wait (!%p663_p11), %s455_s23, 128  }
 0x196   : > { %893 = vsyncadd (!%p663_p11), %s455_s23, 4294967168  ;;  %s463_s19 = sand.u32 1, %s575_s20  }
 0x197   : > { %s464_s11 = scalar_lea.sflag [#allocation9], %s463_s19 }
 0x198   : > { %895 = dma.done.wait (!%p663_p11), %s464_s11, 32  }
 0x199   : > { %897 = vsyncadd (!%p663_p11), %s464_s11, 4294967264  ;;  %p22_p12 = scmp.ge.s32.totalorder %s1008_s27, 4   ;;  %s1257_s15 = smov %s904_s16 }
 0x19a   : > { %s1258_s16 = smov %s908_s17  ;;  %s1259_s17 = smov %s1042_s30 }
 0x19b   : > { %s1260_s18 = smov %s1008_s27  ;;  %24 = sbr.rel (!%p22_p12) target bundleno = 8 (0x8), region = 109 }
 0x1a2   :  { %476 = vsyncpa [#allocation3], 1 }
 0x1a3   :  { %478 = vsyncpa [#allocation3 + $0x1], 1 }
 0x1a4   :  { %479 = vsyncpa [#allocation6], 1 }
 0x1a5   :  { %480 = vsyncpa [#allocation4], 1 }
 0x1a6   :  { %482 = vsyncpa [#allocation4 + $0x1], 1 }
 0x1a7   :  { %483 = vsyncpa [#allocation9], 1 }
 0x1a8   :  { %485 = vsyncpa [#allocation9 + $0x1], 1 }

</bundles_post_ra>
